<compile_context>
chip_gen: v5e
topology: v5e:2x2
jax: 0.10.0
libtpu: 0.0.40
codegen_flags: <defaults>
</compile_context>

<pallas_src>
import numpy as np

import jax
import jax.numpy as jnp
from jax import lax
from jax.experimental import pallas as pl
from jax.experimental.pallas import tpu as pltpu


def _cbam_kernel(x_ref, w1t_ref, w2t_ref, m_ref, o_ref):
    """One grid step processes a block of B images.

    x_ref / o_ref : (B, C, HW) f32   (C on sublanes, HW on lanes)
    w1t_ref       : (C, Cr)  f32     transposed weight of Conv2d(C, C//r, 1)
    w2t_ref       : (Cr, C)  f32     transposed weight of Conv2d(C//r, C, 1)
    m_ref         : (2, HW, HW) f32  dense matmul form of the KxK 'same' conv
                                     (index 0 = avg-map channel, 1 = max-map)
    """
    x = x_ref[...]                                         # (B, C, HW)
    B = x.shape[0]

    # ---------------- channel attention: shared MLP on avg / max pooled ------
    avg_c = jnp.mean(x, axis=2)                            # (B, C)  lane reduce
    max_c = jnp.max(x, axis=2)                             # (B, C)

    def mlp(v):                                            # v: (B, C)
        h = jnp.maximum(
            jnp.dot(v, w1t_ref[...], preferred_element_type=jnp.float32), 0.0)
        return jnp.dot(h, w2t_ref[...], preferred_element_type=jnp.float32)

    ch_att = jax.nn.sigmoid(mlp(avg_c) + mlp(max_c))       # (B, C)

    # Apply channel attention; park x*ch_att in the output VMEM block to keep
    # vreg pressure low while the spatial attention is computed.
    x_ca = x * ch_att[:, :, None]                          # (B, C, HW)
    o_ref[...] = x_ca

    # ---------------- spatial attention: KxK conv as two MXU matmuls ---------
    avg_map = jnp.mean(x_ca, axis=1)                       # (B, HW) sublane red.
    max_map = jnp.max(x_ca, axis=1)                        # (B, HW)
    sp = (jnp.dot(avg_map, m_ref[0], preferred_element_type=jnp.float32)
          + jnp.dot(max_map, m_ref[1], preferred_element_type=jnp.float32))
    sp_att = jax.nn.sigmoid(sp)                            # (B, HW)

    o_ref[...] = o_ref[...] * sp_att[:, None, :]           # bcast over C sublanes


def _spatial_conv_matrix(wsp, H, W):
    """Fold Conv2d(2, 1, K, padding=K//2, bias=False) into a (2, HW, HW) matmul.

    result[ci, p_in, p_out] = wsp[0, ci, di+P, dj+P] for p_in the (zero-padded)
    input position feeding output position p_out at tap (di, dj).
    """
    K = wsp.shape[-1]
    P = K // 2
    HW = H * W
    p_out = np.arange(HW)
    i_out, j_out = p_out // W, p_out % W
    taps = []
    for di in range(-P, P + 1):          # tap order matches wsp.reshape(2, K*K)
        for dj in range(-P, P + 1):
            ii, jj = i_out + di, j_out + dj
            valid = (ii >= 0) & (ii < H) & (jj >= 0) & (jj < W)
            t = np.zeros((HW, HW), np.float32)
            t[(ii * W + jj)[valid], p_out[valid]] = 1.0
            taps.append(t)
    taps = jnp.asarray(np.stack(taps))                     # (K*K, HW, HW) geometry
    w = wsp.astype(jnp.float32).reshape(2, K * K)          # (ci, tap)
    return jnp.tensordot(w, taps, axes=([1], [0]))         # (2, HW, HW)


def cbam_pallas(x, w1, w2, wsp, *, batch_block=None):
    """x: (N, C, H, W) f32; w1: (C//r, C); w2: (C, C//r); wsp: (1, 2, K, K)."""
    N, C, H, W = x.shape
    K = wsp.shape[-1]
    assert K % 2 == 1, "stride-1 'same' conv scheme requires odd kernel size"
    HW = H * W
    Cr = w1.shape[0]

    if batch_block is None:
        cands = [b for b in (8, 4, 2, 1) if N % b == 0]
        # prefer >=2 grid steps so both TensorCores (v7x) / megacore get work
        batch_block = next((b for b in cands if N // b >= 2), cands[0])
    B = batch_block
    assert N % B == 0

    x2 = x.reshape(N, C, HW).astype(jnp.float32)
    w1t = jnp.asarray(w1, jnp.float32).T                   # (C, Cr)
    w2t = jnp.asarray(w2, jnp.float32).T                   # (Cr, C)
    m = _spatial_conv_matrix(wsp, H, W)                    # (2, HW, HW)

    out2 = pl.pallas_call(
        _cbam_kernel,
        out_shape=jax.ShapeDtypeStruct((N, C, HW), jnp.float32),
        grid=(N // B,),
        in_specs=[
            pl.BlockSpec((B, C, HW), lambda n: (n, 0, 0)),       # B images / step
            pl.BlockSpec((C, Cr), lambda n: (0, 0)),             # MLP conv1 weight^T
            pl.BlockSpec((Cr, C), lambda n: (0, 0)),             # MLP conv2 weight^T
            pl.BlockSpec((2, HW, HW), lambda n: (0, 0, 0)),      # dense spatial conv
        ],
        out_specs=pl.BlockSpec((B, C, HW), lambda n: (n, 0, 0)),
        compiler_params=pltpu.CompilerParams(dimension_semantics=("parallel",)),
    )(x2, w1t, w2t, m)
    return out2.reshape(N, C, H, W)


def cbam_ref(x, w1, w2, wsp):
    """Pure-JAX reference matching the PyTorch CBAM forward (NCHW)."""
    hp = lax.Precision.HIGHEST
    avg = jnp.mean(x, axis=(2, 3))                         # (N, C)
    mx = jnp.max(x, axis=(2, 3))                           # (N, C)

    def mlp(v):
        h = jnp.maximum(jnp.einsum("nc,rc->nr", v, w1, precision=hp), 0.0)
        return jnp.einsum("nr,cr->nc", h, w2, precision=hp)

    ch = jax.nn.sigmoid(mlp(avg) + mlp(mx))[:, :, None, None]
    xc = x * ch
    avg_s = jnp.mean(xc, axis=1, keepdims=True)
    max_s = jnp.max(xc, axis=1, keepdims=True)
    inp = jnp.concatenate([avg_s, max_s], axis=1)          # (N, 2, H, W)
    sp = lax.conv_general_dilated(
        inp, wsp, window_strides=(1, 1), padding="SAME",
        dimension_numbers=("NCHW", "OIHW", "NCHW"), precision=hp)
    return xc * jax.nn.sigmoid(sp)


if __name__ == "__main__":
    N, C, H, W = 4, 32, 16, 16          # N=4 -> B=2 per step, 2 parallel grid steps
    reduction, K = 16, 7
    Cr = C // reduction

    key = jax.random.PRNGKey(0)
    k1, k2, k3, k4 = jax.random.split(key, 4)
    x = jax.random.normal(k1, (N, C, H, W), dtype=jnp.float32)
    w1 = jax.random.normal(k2, (Cr, C), dtype=jnp.float32) * 0.2        # Conv2d(C, C//r, 1).weight
    w2 = jax.random.normal(k3, (C, Cr), dtype=jnp.float32) * 0.2        # Conv2d(C//r, C, 1).weight
    wsp = jax.random.normal(k4, (1, 2, K, K), dtype=jnp.float32) * 0.1  # Conv2d(2, 1, 7).weight

    out = jax.block_until_ready(jax.jit(cbam_pallas)(x, w1, w2, wsp))
    ref = jax.block_until_ready(cbam_ref(x, w1, w2, wsp))

    assert out.shape == (N, C, H, W)
    max_diff = float(jnp.max(jnp.abs(out - ref)))
    if not jnp.allclose(out, ref, atol=2e-3, rtol=2e-3):
        raise AssertionError(f"Pallas CBAM mismatch vs reference, max abs diff={max_diff:e}")
    print("KERNEL_OK")
</pallas_src>

<mosaic_0001>
module attributes {stable_mosaic.version = 11 : i64} {
  func.func @_cbam_kernel(%arg0: i32, %arg1: memref<2x32x256xf32, #tpu.memory_space<vmem>>, %arg2: memref<32x2xf32, #tpu.memory_space<vmem>>, %arg3: memref<2x32xf32, #tpu.memory_space<vmem>>, %arg4: memref<2x256x256xf32, #tpu.memory_space<vmem>>, %arg5: memref<2x32x256xf32, #tpu.memory_space<vmem>>) attributes {dimension_semantics = [#tpu.dimension_semantics<parallel>], iteration_bounds = array<i64: 2>, scalar_prefetch = 0 : i64, scratch_operands = 0 : i64, tpu.core_type = #tpu.core_type<tc>, window_params = [{transform_indices = @transform_0, window_bounds = array<i64: 2, 32, 256>}, {pipeline_mode = #tpu.pipeline_mode<synchronous>, transform_indices = @transform_1, window_bounds = array<i64: 32, 2>}, {pipeline_mode = #tpu.pipeline_mode<synchronous>, transform_indices = @transform_2, window_bounds = array<i64: 2, 32>}, {pipeline_mode = #tpu.pipeline_mode<synchronous>, transform_indices = @transform_3, window_bounds = array<i64: 2, 256, 256>}, {transform_indices = @transform_4, window_bounds = array<i64: 2, 32, 256>}]} {
    %c0 = arith.constant 0 : index
    %c0_0 = arith.constant 0 : index
    %c0_1 = arith.constant 0 : index
    %0 = vector.load %arg1[%c0, %c0_0, %c0_1] : memref<2x32x256xf32, #tpu.memory_space<vmem>>, vector<2x32x256xf32>
    %cst = arith.constant dense<0.000000e+00> : vector<2x32xf32>
    %1 = vector.multi_reduction <add>, %0, %cst [2] : vector<2x32x256xf32> to vector<2x32xf32>
    %cst_2 = arith.constant 2.560000e+02 : f32
    %2 = vector.broadcast %cst_2 : f32 to vector<2x32xf32>
    %3 = arith.divf %1, %2 : vector<2x32xf32>
    %cst_3 = arith.constant dense<0xFF800000> : vector<2x32xf32>
    %4 = vector.multi_reduction <maximumf>, %0, %cst_3 [2] : vector<2x32x256xf32> to vector<2x32xf32>
    %c0_4 = arith.constant 0 : index
    %c0_5 = arith.constant 0 : index
    %5 = vector.load %arg2[%c0_4, %c0_5] : memref<32x2xf32, #tpu.memory_space<vmem>>, vector<32x2xf32>
    %cst_6 = arith.constant dense<0.000000e+00> : vector<2x2xf32>
    %6 = tpu.matmul %3, %5, %cst_6 {dimension_numbers = #tpu.dot_dimension_numbers<[1], [0], [0], [1], [0, 0, 1, 1], [], []>} : vector<2x32xf32>, vector<32x2xf32>, vector<2x2xf32> -> vector<2x2xf32>
    %cst_7 = arith.constant 0.000000e+00 : f32
    %7 = vector.broadcast %cst_7 : f32 to vector<2x2xf32>
    %8 = arith.maximumf %6, %7 : vector<2x2xf32>
    %c0_8 = arith.constant 0 : index
    %c0_9 = arith.constant 0 : index
    %9 = vector.load %arg3[%c0_8, %c0_9] : memref<2x32xf32, #tpu.memory_space<vmem>>, vector<2x32xf32>
    %cst_10 = arith.constant dense<0.000000e+00> : vector<2x32xf32>
    %10 = tpu.matmul %8, %9, %cst_10 {dimension_numbers = #tpu.dot_dimension_numbers<[1], [0], [0], [1], [0, 0, 1, 1], [], []>} : vector<2x2xf32>, vector<2x32xf32>, vector<2x32xf32> -> vector<2x32xf32>
    %c0_11 = arith.constant 0 : index
    %c0_12 = arith.constant 0 : index
    %11 = vector.load %arg2[%c0_11, %c0_12] : memref<32x2xf32, #tpu.memory_space<vmem>>, vector<32x2xf32>
    %cst_13 = arith.constant dense<0.000000e+00> : vector<2x2xf32>
    %12 = tpu.matmul %4, %11, %cst_13 {dimension_numbers = #tpu.dot_dimension_numbers<[1], [0], [0], [1], [0, 0, 1, 1], [], []>} : vector<2x32xf32>, vector<32x2xf32>, vector<2x2xf32> -> vector<2x2xf32>
    %cst_14 = arith.constant 0.000000e+00 : f32
    %13 = vector.broadcast %cst_14 : f32 to vector<2x2xf32>
    %14 = arith.maximumf %12, %13 : vector<2x2xf32>
    %c0_15 = arith.constant 0 : index
    %c0_16 = arith.constant 0 : index
    %15 = vector.load %arg3[%c0_15, %c0_16] : memref<2x32xf32, #tpu.memory_space<vmem>>, vector<2x32xf32>
    %cst_17 = arith.constant dense<0.000000e+00> : vector<2x32xf32>
    %16 = tpu.matmul %14, %15, %cst_17 {dimension_numbers = #tpu.dot_dimension_numbers<[1], [0], [0], [1], [0, 0, 1, 1], [], []>} : vector<2x2xf32>, vector<2x32xf32>, vector<2x32xf32> -> vector<2x32xf32>
    %17 = arith.addf %10, %16 : vector<2x32xf32>
    %18 = arith.negf %17 : vector<2x32xf32>
    %19 = math.exp %18 : vector<2x32xf32>
    %cst_18 = arith.constant 1.000000e+00 : f32
    %20 = vector.broadcast %cst_18 : f32 to vector<2x32xf32>
    %21 = arith.addf %20, %19 : vector<2x32xf32>
    %22 = arith.divf %20, %21 : vector<2x32xf32>
    %23 = vector.shape_cast %22 : vector<2x32xf32> to vector<2x32x1xf32>
    %24 = vector.broadcast %23 : vector<2x32x1xf32> to vector<2x32x256xf32>
    %25 = arith.mulf %0, %24 : vector<2x32x256xf32>
    %c0_19 = arith.constant 0 : index
    %c0_20 = arith.constant 0 : index
    %c0_21 = arith.constant 0 : index
    %26 = vector.load %arg5[%c0_19, %c0_20, %c0_21] : memref<2x32x256xf32, #tpu.memory_space<vmem>>, vector<2x32x256xf32>
    tpu.vector_store %arg5[%c0_19, %c0_20, %c0_21], %25 {strides = array<i32>} : memref<2x32x256xf32, #tpu.memory_space<vmem>>, vector<2x32x256xf32>,
    %cst_22 = arith.constant dense<0.000000e+00> : vector<2x256xf32>
    %27 = vector.multi_reduction <add>, %25, %cst_22 [1] : vector<2x32x256xf32> to vector<2x256xf32>
    %cst_23 = arith.constant 3.200000e+01 : f32
    %28 = vector.broadcast %cst_23 : f32 to vector<2x256xf32>
    %29 = arith.divf %27, %28 : vector<2x256xf32>
    %cst_24 = arith.constant dense<0xFF800000> : vector<2x256xf32>
    %30 = vector.multi_reduction <maximumf>, %25, %cst_24 [1] : vector<2x32x256xf32> to vector<2x256xf32>
    %c0_25 = arith.constant 0 : index
    %c0_26 = arith.constant 0 : index
    %c0_27 = arith.constant 0 : index
    %31 = vector.load %arg4[%c0_25, %c0_26, %c0_27] : memref<2x256x256xf32, #tpu.memory_space<vmem>>, vector<1x256x256xf32>
    %32 = vector.shape_cast %31 : vector<1x256x256xf32> to vector<256x256xf32>
    %cst_28 = arith.constant dense<0.000000e+00> : vector<2x256xf32>
    %33 = tpu.matmul %29, %32, %cst_28 {dimension_numbers = #tpu.dot_dimension_numbers<[1], [0], [0], [1], [0, 0, 1, 1], [], []>} : vector<2x256xf32>, vector<256x256xf32>, vector<2x256xf32> -> vector<2x256xf32>
    %c1 = arith.constant 1 : index
    %c0_29 = arith.constant 0 : index
    %c0_30 = arith.constant 0 : index
    %34 = vector.load %arg4[%c1, %c0_29, %c0_30] : memref<2x256x256xf32, #tpu.memory_space<vmem>>, vector<1x256x256xf32>
    %35 = vector.shape_cast %34 : vector<1x256x256xf32> to vector<256x256xf32>
    %cst_31 = arith.constant dense<0.000000e+00> : vector<2x256xf32>
    %36 = tpu.matmul %30, %35, %cst_31 {dimension_numbers = #tpu.dot_dimension_numbers<[1], [0], [0], [1], [0, 0, 1, 1], [], []>} : vector<2x256xf32>, vector<256x256xf32>, vector<2x256xf32> -> vector<2x256xf32>
    %37 = arith.addf %33, %36 : vector<2x256xf32>
    %38 = arith.negf %37 : vector<2x256xf32>
    %39 = math.exp %38 : vector<2x256xf32>
    %cst_32 = arith.constant 1.000000e+00 : f32
    %40 = vector.broadcast %cst_32 : f32 to vector<2x256xf32>
    %41 = arith.addf %40, %39 : vector<2x256xf32>
    %42 = arith.divf %40, %41 : vector<2x256xf32>
    %c0_33 = arith.constant 0 : index
    %c0_34 = arith.constant 0 : index
    %c0_35 = arith.constant 0 : index
    %43 = vector.load %arg5[%c0_33, %c0_34, %c0_35] : memref<2x32x256xf32, #tpu.memory_space<vmem>>, vector<2x32x256xf32>
    %44 = vector.shape_cast %42 : vector<2x256xf32> to vector<2x1x256xf32>
    %45 = vector.broadcast %44 : vector<2x1x256xf32> to vector<2x32x256xf32>
    %46 = arith.mulf %43, %45 : vector<2x32x256xf32>
    %c0_36 = arith.constant 0 : index
    %c0_37 = arith.constant 0 : index
    %c0_38 = arith.constant 0 : index
    %47 = vector.load %arg5[%c0_36, %c0_37, %c0_38] : memref<2x32x256xf32, #tpu.memory_space<vmem>>, vector<2x32x256xf32>
    tpu.vector_store %arg5[%c0_36, %c0_37, %c0_38], %46 {strides = array<i32>} : memref<2x32x256xf32, #tpu.memory_space<vmem>>, vector<2x32x256xf32>,
    return
  }
  func.func @transform_0(%arg0: i32) -> (i32, i32, i32) {
    %c0_i32 = arith.constant 0 : i32
    %c0_i32_0 = arith.constant 0 : i32
    %c0_i32_1 = arith.constant 0 : i32
    return %arg0, %c0_i32, %c0_i32_0 : i32, i32, i32
  }
  func.func @transform_1(%arg0: i32) -> (i32, i32) {
    %c0_i32 = arith.constant 0 : i32
    %c0_i32_0 = arith.constant 0 : i32
    %c0_i32_1 = arith.constant 0 : i32
    return %c0_i32, %c0_i32_0 : i32, i32
  }
  func.func @transform_2(%arg0: i32) -> (i32, i32) {
    %c0_i32 = arith.constant 0 : i32
    %c0_i32_0 = arith.constant 0 : i32
    %c0_i32_1 = arith.constant 0 : i32
    return %c0_i32, %c0_i32_0 : i32, i32
  }
  func.func @transform_3(%arg0: i32) -> (i32, i32, i32) {
    %c0_i32 = arith.constant 0 : i32
    %c0_i32_0 = arith.constant 0 : i32
    %c0_i32_1 = arith.constant 0 : i32
    %c0_i32_2 = arith.constant 0 : i32
    return %c0_i32, %c0_i32_0, %c0_i32_1 : i32, i32, i32
  }
  func.func @transform_4(%arg0: i32) -> (i32, i32, i32) {
    %c0_i32 = arith.constant 0 : i32
    %c0_i32_0 = arith.constant 0 : i32
    %c0_i32_1 = arith.constant 0 : i32
    return %arg0, %c0_i32, %c0_i32_0 : i32, i32, i32
  }
}

</mosaic_0001>

<bundles_post_ra>
// kernel: cbam_pallas.1
= control target key start
LH: loop header
LB: loop body
LE: loop exit
PB: predicated region body
PF: predicated region fallthrough
CT: control target
= control target key end

     0   :  { %s1248_s15 = smov 0   ;;  %s1901_s0 = inlined_call_operand.vmem [shape: f32[4,32,256], index: 0, kind: input, shape index: {}]   ;;  %s1902_s1 = inlined_call_operand.vmem [shape: f32[32,2], index: 1, kind: input, shape index: {}]   ;;  %s1903_s2 = inlined_call_operand.vmem [shape: f32[2,32], index: 2, kind: input, shape index: {}]   ;;  %s1904_s3 = inlined_call_operand.vmem [shape: f32[2,256,256], index: 3, kind: input, shape index: {}]   ;;  %s1905_s4 = inlined_call_operand.vmem [shape: f32[4,32,256], index: 4, kind: output, shape index: {}]  }
   0x1 LB: > { %s1091_s16 = sadd.s32 4294967295, %s1219_s15   ;;  %p1095_p0 = scmp.ge.s32.totalorder %s1219_s15, 1  ;;  %s1219_s15 = sphi %s1248_s15, %s14_s15  }
   0x2   : > { %p164_p1 = scmp.lt.s32.totalorder %s1219_s15, 3 }
   0x4   : > { %p165_p2 = pnand %p1095_p0, %p164_p1 }
   0x5   : > { %s1096_s17 = sshll.u32 (!%p165_p2), %s1091_s16, 1 }
   0x6   : > { %168 = sbr.rel (%p165_p2) target bundleno = 828 (0x33c), region = 36  ;;  %p193_p3 = scmp.lt.s32.totalorder (!%p165_p2), %s1096_s17, 3 }
   0xb   : > { %s1907_s17 = smov (!%p193_p3, %s1096_s17), 3  ;;  %v288_v32 = vld [vmem:[%s1902_s1 + $0x18] sm:$0xff]  ;;  %v1221_v33 = vmov 256.0   ;;  %v287_v34 = vld [vmem:[%s1902_s1 + $0x10] sm:$0xff]  ;;  %v286_v35 = vld [vmem:[%s1902_s1 + $0x8] sm:$0xff]  ;;  %v297_v44 = vlaneseq  ;;  %vm302_vm1 = vcmask 130112  }
   0xc   : > { %s1177_s18 = sshll.u32 %s1907_s17, 6  ;;  %1197 = vrcp.f32 %v1221_v33  ;;  %336 = vmatpush.msra.mxu0 %v288_v32  ;;  %383 = vmatpush.msra.mxu1 %v288_v32  ;;  %v285_v36 = vld [vmem:[%s1902_s1] sm:$0xff]  ;;  %vm306_vm2 = vcmask 195712   ;;  %vm310_vm3 = vcmask 261312   ;;  %vm319_vm4 = vcmask 1041409  }
   0xd   : > { %s197_s21 = scalar_lea.vmem %s1901_s0, %s1177_s18  ;;  %v298_v46 = vand.u32 127, %v297_v44  ;;  %vm321_vm5 = vcmask 261120   ;;  %vm396_vm6 = vcmask 1041408   ;;  %vm392_vm7 = vcmask 15360   ;;  %s1432_s6 = scalar_lea.vmem %s1905_s4, %s1177_s18 }
   0xe   : > { %v1264_v0 = vld [vmem:[%s197_s21 + $0x40] sm:$0xff]  ;;  %v1266_v1 = vld [vmem:[%s197_s21 + $0x48] sm:$0xff]  ;;  %v1282_v9 = vld [vmem:[%s197_s21 + $0x50] sm:$0xff]  ;;  %337 = vmatpush.msra.mxu0 %v287_v34  ;;  %384 = vmatpush.msra.mxu1 %v287_v34 }
   0xf   : > { %v1268_v2 = vld [vmem:[%s197_s21] sm:$0xff]  ;;  %v234_v3 = vadd.f32 %v1266_v1, %v1264_v0  ;;  %v1272_v4 = vld [vmem:[%s197_s21 + $0x8] sm:$0xff]  ;;  %v1284_v10 = vld [vmem:[%s197_s21 + $0x58] sm:$0xff]  ;;  %v273_v25 = vmax.f32 %v1264_v0, %v1266_v1  ;;  %v300_v50 = vadd.s32 4294967288, %v298_v46  ;;  %v304_v56 = vadd.s32 4294967280, %v298_v46 }
  0x10   : > { %v1274_v5 = vld [vmem:[%s197_s21 + $0x20] sm:$0xff]  ;;  %v1276_v6 = vld [vmem:[%s197_s21 + $0x28] sm:$0xff]  ;;  %v222_v7 = vadd.f32 %v1272_v4, %v1268_v2  ;;  %v1286_v11 = vld [vmem:[%s197_s21 + $0x10] sm:$0xff]  ;;  %v237_v15 = vadd.f32 %v1284_v10, %v1282_v9  ;;  %v261_v24 = vmax.f32 %v1268_v2, %v1272_v4  ;;  %v276_v27 = vmax.f32 %v1282_v9, %v1284_v10  ;;  %338 = vmatpush.msra.mxu0 %v286_v35 }
  0x11   : > { %v228_v8 = vadd.f32 %v1276_v6, %v1274_v5  ;;  %235 = vadd.xlane.f32.xlu1 %v234_v3  ;;  %v1288_v12 = vld [vmem:[%s197_s21 + $0x18] sm:$0xff]  ;;  %v1290_v13 = vld [vmem:[%s197_s21 + $0x60] sm:$0xff]  ;;  %v1292_v14 = vld [vmem:[%s197_s21 + $0x68] sm:$0xff]  ;;  %v267_v29 = vmax.f32 %v1274_v5, %v1276_v6  ;;  %385 = vmatpush.msra.mxu1 %v286_v35  ;;  %v308_v62 = vadd.s32 4294967272, %v298_v46 }
  0x12   : > { %223 = vadd.xlane.f32.xlu0 %v222_v7  ;;  %v225_v16 = vadd.f32 %v1288_v12, %v1286_v11  ;;  %v240_v17 = vadd.f32 %v1292_v14, %v1290_v13  ;;  %v1300_v18 = vld [vmem:[%s197_s21 + $0x70] sm:$0xff]  ;;  %v1302_v19 = vld [vmem:[%s197_s21 + $0x78] sm:$0xff]  ;;  %v264_v26 = vmax.f32 %v1286_v11, %v1288_v12  ;;  %v279_v28 = vmax.f32 %v1290_v13, %v1292_v14  ;;  %v1198_v37 = vpop.eup %1197 }
  0x13   : > { %229 = vadd.xlane.f32.xlu2 %v228_v8  ;;  %v1304_v20 = vld [vmem:[%s197_s21 + $0x30] sm:$0xff]  ;;  %v1306_v21 = vld [vmem:[%s197_s21 + $0x38] sm:$0xff]  ;;  %v243_v22 = vadd.f32 %v1302_v19, %v1300_v18  ;;  %v282_v31 = vmax.f32 %v1300_v18, %v1302_v19  ;;  %339 = vmatpush.msra.mxu0 %v285_v36  ;;  %v247_v38 = vmul.f32 256.0, %v1198_v37  ;;  %vm251_vm0 = vweird.f32 %v1198_v37 }
  0x14   : > { %v231_v23 = vadd.f32 %v1306_v21, %v1304_v20  ;;  %v270_v30 = vmax.f32 %v1304_v20, %v1306_v21  ;;  %386 = vmatpush.msra.mxu1 %v285_v36 }
  0x15   : > { %v248_v39 = vsub.f32 1.0, %v247_v38 }
  0x17   : > { %v249_v40 = vmul.f32 %v1198_v37, %v248_v39 }
  0x19   : > { %238 = vadd.xlane.f32.xlu1 %v237_v15  ;;  %v250_v45 = vadd.f32 %v1198_v37, %v249_v40 }
  0x1a   : > { %226 = vadd.xlane.f32.xlu0 %v225_v16 }
  0x1b   : > { %241 = vadd.xlane.f32.xlu2 %v240_v17  ;;  %v252_v47 = vsel %vm251_vm0, %v1198_v37, %v250_v45 }
  0x21   : > { %244 = vadd.xlane.f32.xlu1 %v243_v22 }
  0x22   : > { %232 = vadd.xlane.f32.xlu0 %v231_v23 }
  0x23   : > { %262 = vmax.xlane.f32.xlu2 %v261_v24 }
  0x29   : > { %274 = vmax.xlane.f32.xlu1 %v273_v25 }
  0x2a   : > { %265 = vmax.xlane.f32.xlu0 %v264_v26 }
  0x2b   : > { %277 = vmax.xlane.f32.xlu2 %v276_v27 }
  0x31   : > { %280 = vmax.xlane.f32.xlu1 %v279_v28 }
  0x32   : > { %268 = vmax.xlane.f32.xlu0 %v267_v29 }
  0x33   : > { %271 = vmax.xlane.f32.xlu2 %v270_v30 }
  0x3a   : > { %283 = vmax.xlane.f32.xlu0 %v282_v31 }
  0x84   : > { %v236_v41 = vpop.xlane.xlu1 %235 }
  0x85   : > { %v224_v42 = vpop.xlane.xlu0 %223  ;;  %v257_v49 = vmul.f32 %v252_v47, %v236_v41 }
  0x86   : > { %v230_v43 = vpop.xlane.xlu2 %229  ;;  %v253_v55 = vmul.f32 %v252_v47, %v224_v42 }
  0x87   : > { %v312_v58 = vperm.slane %v257_v49, %v298_v46  ;;  %v255_v59 = vmul.f32 %v252_v47, %v230_v43 }
  0x88   : > { %v299_v63 = vperm.slane %v253_v55, %v298_v46  ;;  %v345_v55 = vld [vmem:[%s1903_s2] sm:$0x3] }
  0x89   : > { %v305_v8 = vperm.slane %v255_v59, %v304_v56  ;;  %1106 = vmatpush.msk.msra.mxu3 %vm396_vm6, %v345_v55  ;;  %1104 = vmatpush.msk.msra.mxu2 %vm396_vm6, %v345_v55  ;;  %v1161_v55 = vld [vmem:[%s1904_s3 + $0x3a0] sm:$0xff] }
  0x8c   : > { %v239_v48 = vpop.xlane.xlu1 %238 }
  0x8d   : > { %v258_v51 = vmul.f32 %v252_v47, %v239_v48  ;;  %v227_v52 = vpop.xlane.xlu0 %226 }
  0x8e   : > { %v242_v53 = vpop.xlane.xlu2 %241  ;;  %v254_v54 = vmul.f32 %v252_v47, %v227_v52 }
  0x8f   : > { %v259_v57 = vmul.f32 %v252_v47, %v242_v53  ;;  %v313_v60 = vperm.slane %v258_v51, %v300_v50 }
  0x90   : > { %v301_v61 = vperm.slane %v254_v54, %v300_v50 }
  0x91   : > { %v315_v3 = vperm.slane %v259_v57, %v304_v56  ;;  %v314_v15 = vsel %vm302_vm1, %v313_v60, %v312_v58  ;;  %v464_v60 = vshrl.u32 %v297_v44, 7 }
  0x92   : > { %v303_v23 = vsel %vm302_vm1, %v301_v61, %v299_v63 }
  0x93   : > { %v316_v27 = vsel %vm306_vm2, %v315_v3, %v314_v15  ;;  %v307_v28 = vsel %vm306_vm2, %v305_v8, %v303_v23  ;;  %1191 = vset.pattern.permute.xlu0 %v464_v60  ;;  %1189 = vset.pattern.permute.xlu1 %v464_v60  ;;  %v471_v61 = vadd.s32 8, %v464_v60 }
  0x94   : > { %v245_v7 = vpop.xlane.xlu1 %244 }
  0x95   : > { %v260_v16 = vmul.f32 %v252_v47, %v245_v7  ;;  %v233_v17 = vpop.xlane.xlu0 %232  ;;  %1190 = vset.pattern.permute.xlu2 %v471_v61 }
  0x96   : > { %v263_v22 = vpop.xlane.xlu2 %262  ;;  %v256_v24 = vmul.f32 %v252_v47, %v233_v17 }
  0x97   : > { %v317_v25 = vperm.slane %v260_v16, %v308_v62  ;;  %v354_v36 = vperm.slane %v263_v22, %v298_v46 }
  0x98   : > { %v309_v26 = vperm.slane %v256_v24, %v308_v62 }
  0x99   : > { %v318_v29 = vsel %vm310_vm3, %v317_v25, %v316_v27 }
  0x9a   : > { %v311_v30 = vsel %vm310_vm3, %v309_v26, %v307_v28 }
  0x9b   : > { %v320_v31 = vsel %vm319_vm4, %v318_v29, %v311_v30 }
  0x9c   : > { %1102 = vmatmul.msk.f32.vlgmr.msra.gmra.mxu0 %vm321_vm5, %v320_v31  ;;  %v275_v33 = vpop.xlane.xlu1 %274  ;;  %v477_v31 = vadd.s32 16, %v464_v60 }
  0x9d   : > { %v266_v32 = vpop.xlane.xlu0 %265  ;;  %v361_v37 = vperm.slane %v275_v33, %v298_v46  ;;  %v1139_v33 = vld [vmem:[%s1904_s3 + $0x2f0] sm:$0xff] }
  0x9e   : > { %v278_v34 = vpop.xlane.xlu2 %277  ;;  %v355_v38 = vperm.slane %v266_v32, %v300_v50  ;;  %v483_v32 = vadd.s32 24, %v464_v60  ;;  %764 = vmatpush.msrb.mxu2 %v1139_v33  ;;  %v1118_v33 = vld [vmem:[%s1904_s3 + $0x248] sm:$0xff] }
  0x9f   : > { %v362_v39 = vperm.slane %v278_v34, %v300_v50  ;;  %v1171_v34 = vld [vmem:[%s1904_s3 + $0x3f0] sm:$0xff] }
  0xa0   : > { %v356_v45 = vsel %vm302_vm1, %v355_v38, %v354_v36  ;;  %784 = vmatpush.msrb.mxu3 %v1171_v34  ;;  %v1172_v36 = vld [vmem:[%s1904_s3 + $0x3f8] sm:$0xff]  ;;  %v1169_v38 = vld [vmem:[%s1904_s3 + $0x3e0] sm:$0xff]  ;;  %v1150_v34 = vld [vmem:[%s1904_s3 + $0x348] sm:$0xff] }
  0xa1   : > { %v363_v47 = vsel %vm302_vm1, %v362_v39, %v361_v37  ;;  %v1137_v37 = vld [vmem:[%s1904_s3 + $0x2e0] sm:$0xff]  ;;  %824 = vmatpush.msrb.mxu1 %v1172_v36  ;;  %v1138_v39 = vld [vmem:[%s1904_s3 + $0x2e8] sm:$0xff]  ;;  %v1147_v36 = vld [vmem:[%s1904_s3 + $0x330] sm:$0xff] }
  0xa2   : > { %765 = vmatpush.msrb.mxu2 %v1137_v37  ;;  %785 = vmatpush.msrb.mxu3 %v1169_v38  ;;  %v1116_v37 = vld [vmem:[%s1904_s3 + $0x238] sm:$0xff] }
  0xa3   : > { %v1148_v38 = vld [vmem:[%s1904_s3 + $0x338] sm:$0xff] }
  0xa4   : > { %v281_v40 = vpop.xlane.xlu1 %280 }
  0xa5   : > { %v269_v35 = vpop.xlane.xlu0 %268  ;;  %v364_v43 = vperm.slane %v281_v40, %v304_v56  ;;  %v1170_v40 = vld [vmem:[%s1904_s3 + $0x3e8] sm:$0xff] }
  0xa6   : > { %v357_v41 = vperm.slane %v269_v35, %v304_v56  ;;  %v272_v42 = vpop.xlane.xlu2 %271  ;;  %v1140_v35 = vld [vmem:[%s1904_s3 + $0x2f8] sm:$0xff]  ;;  %825 = vmatpush.msrb.mxu1 %v1170_v40  ;;  %v1145_v40 = vld [vmem:[%s1904_s3 + $0x320] sm:$0xff] }
  0xa7   : > { %v359_v48 = vperm.slane %v272_v42, %v308_v62  ;;  %v365_v53 = vsel %vm306_vm2, %v364_v43, %v363_v47  ;;  %804 = vmatpush.msrb.mxu0 %v1140_v35  ;;  %v1167_v42 = vld [vmem:[%s1904_s3 + $0x3d0] sm:$0xff]  ;;  %v1136_v43 = vld [vmem:[%s1904_s3 + $0x2d8] sm:$0xff]  ;;  %v1133_v47 = vld [vmem:[%s1904_s3 + $0x2c0] sm:$0xff] }
  0xa8   : > { %v358_v49 = vsel %vm306_vm2, %v357_v41, %v356_v45  ;;  %v1135_v41 = vld [vmem:[%s1904_s3 + $0x2d0] sm:$0xff]  ;;  %v1168_v45 = vld [vmem:[%s1904_s3 + $0x3d8] sm:$0xff]  ;;  %786 = vmatpush.msrb.mxu3 %v1167_v42  ;;  %v1146_v42 = vld [vmem:[%s1904_s3 + $0x328] sm:$0xff] }
  0xa9   : > { %v360_v54 = vsel %vm310_vm3, %v359_v48, %v358_v49  ;;  %805 = vmatpush.msrb.mxu0 %v1138_v39  ;;  %766 = vmatpush.msrb.mxu2 %v1135_v41  ;;  %v1165_v48 = vld [vmem:[%s1904_s3 + $0x3c0] sm:$0xff]  ;;  %v1134_v49 = vld [vmem:[%s1904_s3 + $0x2c8] sm:$0xff]  ;;  %v1115_v35 = vld [vmem:[%s1904_s3 + $0x230] sm:$0xff] }
  0xaa   : > { %826 = vmatpush.msrb.mxu1 %v1168_v45  ;;  %787 = vmatpush.msrb.mxu3 %v1165_v48  ;;  %v1113_v39 = vld [vmem:[%s1904_s3 + $0x220] sm:$0xff]  ;;  %v1114_v41 = vld [vmem:[%s1904_s3 + $0x228] sm:$0xff]  ;;  %v1143_v45 = vld [vmem:[%s1904_s3 + $0x310] sm:$0xff] }
  0xab   : > { %806 = vmatpush.msrb.mxu0 %v1136_v43  ;;  %767 = vmatpush.msrb.mxu2 %v1133_v47  ;;  %v1111_v43 = vld [vmem:[%s1904_s3 + $0x210] sm:$0xff]  ;;  %v1112_v47 = vld [vmem:[%s1904_s3 + $0x218] sm:$0xff] }
  0xac   : > { %v1144_v48 = vld [vmem:[%s1904_s3 + $0x318] sm:$0xff] }
  0xad   : > { %v284_v51 = vpop.xlane.xlu0 %283  ;;  %807 = vmatpush.msrb.mxu0 %v1134_v49  ;;  %v1109_v49 = vld [vmem:[%s1904_s3 + $0x200] sm:$0xff] }
  0xae   : > { %v366_v52 = vperm.slane %v284_v51, %v308_v62  ;;  %v1166_v51 = vld [vmem:[%s1904_s3 + $0x3c8] sm:$0xff] }
  0xaf   : > { %827 = vmatpush.msrb.mxu1 %v1166_v51  ;;  %v1141_v51 = vld [vmem:[%s1904_s3 + $0x300] sm:$0xff] }
  0xb0   : > { %v367_v46 = vsel %vm310_vm3, %v366_v52, %v365_v53  ;;  %v1131_v52 = vld [vmem:[%s1904_s3 + $0x2b0] sm:$0xff] }
  0xb1   : > { %v368_v50 = vsel %vm319_vm4, %v367_v46, %v360_v54  ;;  %v1163_v53 = vld [vmem:[%s1904_s3 + $0x3b0] sm:$0xff]  ;;  %v1132_v54 = vld [vmem:[%s1904_s3 + $0x2b8] sm:$0xff]  ;;  %768 = vmatpush.msrb.mxu2 %v1131_v52  ;;  %v1110_v52 = vld [vmem:[%s1904_s3 + $0x208] sm:$0xff] }
  0xb2   : > { %1103 = vmatmul.msk.f32.vlgmr.msra.gmra.mxu1 %vm321_vm5, %v368_v50  ;;  %788 = vmatpush.msrb.mxu3 %v1163_v53  ;;  %v1164_v46 = vld [vmem:[%s1904_s3 + $0x3b8] sm:$0xff]  ;;  %v1129_v50 = vld [vmem:[%s1904_s3 + $0x2a0] sm:$0xff]  ;;  %v1142_v53 = vld [vmem:[%s1904_s3 + $0x308] sm:$0xff]  ;;  %vm989_vm5 = vcmask 1040384  }
  0xb3   : > { %808 = vmatpush.msrb.mxu0 %v1132_v54  ;;  %828 = vmatpush.msrb.mxu1 %v1164_v46  ;;  %v657_v54 = vld [vmem:[%s1904_s3 + $0xf0] sm:$0xff] }
  0xb4   : > { %769 = vmatpush.msrb.mxu2 %v1129_v50  ;;  %789 = vmatpush.msrb.mxu3 %v1161_v55  ;;  %v689_v46 = vld [vmem:[%s1904_s3 + $0x1f0] sm:$0xff]  ;;  %v658_v50 = vld [vmem:[%s1904_s3 + $0xf8] sm:$0xff] }
  0xb5   : > { %v690_v55 = vld [vmem:[%s1904_s3 + $0x1f8] sm:$0xff] }
 0x119   : > { %v341_v56 = vpop.f32.mrf.mxu0 }
 0x11a   : > { %v344_v57 = vmax.f32 %v341_v56, 0.0 }
 0x11c   : > { %1107 = vmatmul.msk.f32.vlgmr.msra.gmra.mxu3 %vm392_vm7, %v344_v57  ;;  %v1130_v57 = vld [vmem:[%s1904_s3 + $0x2a8] sm:$0xff] }
 0x11d   : > { %809 = vmatpush.msrb.mxu0 %v1130_v57  ;;  %v687_v57 = vld [vmem:[%s1904_s3 + $0x1e0] sm:$0xff] }
 0x12f   : > { %v388_v58 = vpop.f32.mrf.mxu1 }
 0x130   : > { %v391_v59 = vmax.f32 %v388_v58, 0.0  ;;  %v1162_v58 = vld [vmem:[%s1904_s3 + $0x3a8] sm:$0xff] }
 0x131   : > { %829 = vmatpush.msrb.mxu1 %v1162_v58  ;;  %v656_v58 = vld [vmem:[%s1904_s3 + $0xe8] sm:$0xff] }
 0x132   : > { %1105 = vmatmul.msk.f32.vlgmr.msra.gmra.mxu2 %vm392_vm7, %v391_v59  ;;  %v1127_v59 = vld [vmem:[%s1904_s3 + $0x290] sm:$0xff] }
 0x133   : > { %770 = vmatpush.msrb.mxu2 %v1127_v59 }
 0x19f   : > { %v440_v62 = vpop.f32.mrf.mxu3 }
 0x1b5   : > { %v417_v63 = vpop.f32.mrf.mxu2 }
 0x1b6   : > { %v441_v3 = vadd.f32 %v440_v62, %v417_v63  ;;  %v1159_v62 = vld [vmem:[%s1904_s3 + $0x390] sm:$0xff]  ;;  %v1128_v63 = vld [vmem:[%s1904_s3 + $0x298] sm:$0xff] }
 0x1b7   : > { %790 = vmatpush.msrb.mxu3 %v1159_v62  ;;  %810 = vmatpush.msrb.mxu0 %v1128_v63  ;;  %v688_v62 = vld [vmem:[%s1904_s3 + $0x1e8] sm:$0xff] }
 0x1b8   : > { %v1108_v7 = vmul.f32 -1.442695, %v441_v3  ;;  %v1160_v3 = vld [vmem:[%s1904_s3 + $0x398] sm:$0xff] }
 0x1b9   : > { %830 = vmatpush.msrb.mxu1 %v1160_v3 }
 0x1ba   : > { %1199 = vpow2.f32 %v1108_v7  ;;  %v1126_v7 = vld [vmem:[%s1904_s3 + $0x288] sm:$0xff] }
 0x1bb   : > { %811 = vmatpush.msrb.mxu0 %v1126_v7 }
 0x1c0   : > { %v1200_v8 = vpop.eup %1199 }
 0x1c1   : > { %v446_v15 = vadd.f32 1.0, %v1200_v8  ;;  %v1158_v8 = vld [vmem:[%s1904_s3 + $0x388] sm:$0xff] }
 0x1c2   : > { %831 = vmatpush.msrb.mxu1 %v1158_v8  ;;  %v653_v8 = vld [vmem:[%s1904_s3 + $0xd0] sm:$0xff] }
 0x1c3   : > { %1201 = vrcp.f32 %v446_v15  ;;  %v458_v23 = vand.u32 2147483648, %v446_v15  ;;  %v456_v25 = vand.u32 2147483647, %v446_v15  ;;  %vm452_vm9 = vweird.f32 %v446_v15 }
 0x1c5   : > { %v459_v26 = vor.u32 1.1754944e-38, %v458_v23  ;;  %vm457_vm11 = vcmp.eq.f32.partialorder %v456_v25, 8.507059e+37  ;;  %v1121_v23 = vld [vmem:[%s1904_s3 + $0x260] sm:$0xff]  ;;  %v1122_v25 = vld [vmem:[%s1904_s3 + $0x268] sm:$0xff] }
 0x1c9   : > { %v1202_v16 = vpop.eup %1201 }
 0x1ca   : > { %v448_v17 = vmul.f32 %v1202_v16, %v446_v15  ;;  %vm453_vm8 = vweird.f32 %v1202_v16  ;;  %v1123_v15 = vld [vmem:[%s1904_s3 + $0x270] sm:$0xff] }
 0x1cb   : > { %vm454_vm10 = vmor %vm452_vm9, %vm453_vm8 }
 0x1cc   : > { %v449_v22 = vsub.f32 1.0, %v448_v17  ;;  %v1124_v17 = vld [vmem:[%s1904_s3 + $0x278] sm:$0xff] }
 0x1cd   : > { %812 = vmatpush.msrb.mxu0 %v1124_v17  ;;  %v684_v17 = vld [vmem:[%s1904_s3 + $0x1c8] sm:$0xff] }
 0x1ce   : > { %v450_v24 = vmul.f32 %v1202_v16, %v449_v22  ;;  %v1156_v22 = vld [vmem:[%s1904_s3 + $0x378] sm:$0xff] }
 0x1cf   : > { %832 = vmatpush.msrb.mxu1 %v1156_v22  ;;  %813 = vmatpush.msrb.mxu0 %v1122_v25  ;;  %v649_v22 = vld [vmem:[%s1904_s3 + $0xb0] sm:$0xff]  ;;  %v650_v25 = vld [vmem:[%s1904_s3 + $0xb8] sm:$0xff] }
 0x1d0   : > { %v451_v44 = vadd.f32 %v1202_v16, %v450_v24  ;;  %v1153_v24 = vld [vmem:[%s1904_s3 + $0x360] sm:$0xff] }
 0x1d2   : > { %v455_v27 = vsel %vm454_vm10, %v1202_v16, %v451_v44  ;;  %v1155_v16 = vld [vmem:[%s1904_s3 + $0x370] sm:$0xff]  ;;  %v1154_v44 = vld [vmem:[%s1904_s3 + $0x368] sm:$0xff] }
 0x1d3   : > { %v460_v28 = vsel %vm457_vm11, %v459_v26, %v455_v27  ;;  %v1119_v27 = vld [vmem:[%s1904_s3 + $0x250] sm:$0xff]  ;;  %833 = vmatpush.msrb.mxu1 %v1154_v44  ;;  %v682_v44 = vld [vmem:[%s1904_s3 + $0x1b8] sm:$0xff] }
 0x1d4   : > { %v487_v29 = vperm.slane %v460_v28, 1  ;;  %v462_v30 = vperm.slane %v460_v28, 0  ;;  %v1151_v28 = vld [vmem:[%s1904_s3 + $0x350] sm:$0xff] }
 0x1d6   : > { %492 = vperm.xlu0 %1191, %v487_v29   ;;  %473 = vperm.xlu2 %1190, %v462_v30  }
 0x1d7   : > { %467 = vperm.xlu1 %1189, %v462_v30  }
 0x1de   : > { %498 = vperm.xlu2 %1190, %v487_v29   ;;  %1196 = vset.pattern.permute.xlu0 %v483_v32 }
 0x1df   : > { %1192 = vset.pattern.permute.xlu1 %v477_v31 }
 0x1e6   : > { %1193 = vset.pattern.permute.xlu2 %v477_v31  ;;  %v1120_v31 = vld [vmem:[%s1904_s3 + $0x258] sm:$0xff] }
 0x1e7   : > { %479 = vperm.xlu1 %1192, %v462_v30   ;;  %814 = vmatpush.msrb.mxu0 %v1120_v31  ;;  %v680_v31 = vld [vmem:[%s1904_s3 + $0x1a8] sm:$0xff] }
 0x1e9   : > { %815 = vmatpush.msrb.mxu0 %v1118_v33  ;;  %v678_v33 = vld [vmem:[%s1904_s3 + $0x198] sm:$0xff] }
 0x1eb   : > { %816 = vmatpush.msrb.mxu0 %v1116_v37  ;;  %v676_v37 = vld [vmem:[%s1904_s3 + $0x188] sm:$0xff] }
 0x1ed   : > { %817 = vmatpush.msrb.mxu0 %v1114_v41  ;;  %v642_v41 = vld [vmem:[%s1904_s3 + $0x78] sm:$0xff] }
 0x1ee   : > { %504 = vperm.xlu2 %1193, %v487_v29  }
 0x1ef   : > { %1194 = vset.pattern.permute.xlu1 %v483_v32  ;;  %818 = vmatpush.msrb.mxu0 %v1112_v47 }
 0x1f1   : > { %819 = vmatpush.msrb.mxu0 %v1110_v52 }
 0x1f3   : > { %892 = vmatpush.msra.mxu0 %v658_v50  ;;  %v672_v50 = vld [vmem:[%s1904_s3 + $0x168] sm:$0xff] }
 0x1f5   : > { %893 = vmatpush.msra.mxu0 %v656_v58 }
 0x1f6   : > { %1195 = vset.pattern.permute.xlu2 %v483_v32  ;;  %v1152_v32 = vld [vmem:[%s1904_s3 + $0x358] sm:$0xff] }
 0x1f7   : > { %485 = vperm.xlu1 %1194, %v462_v30   ;;  %834 = vmatpush.msrb.mxu1 %v1152_v32  ;;  %v645_v32 = vld [vmem:[%s1904_s3 + $0x90] sm:$0xff] }
 0x1f9   : > { %835 = vmatpush.msrb.mxu1 %v1150_v34  ;;  %v643_v34 = vld [vmem:[%s1904_s3 + $0x80] sm:$0xff] }
 0x1fb   : > { %836 = vmatpush.msrb.mxu1 %v1148_v38  ;;  %v641_v38 = vld [vmem:[%s1904_s3 + $0x70] sm:$0xff] }
 0x1fd   : > { %837 = vmatpush.msrb.mxu1 %v1146_v42 }
 0x1fe   : > { %510 = vperm.xlu2 %1195, %v487_v29  }
 0x1ff   : > { %838 = vmatpush.msrb.mxu1 %v1144_v48 }
 0x201   : > { %839 = vmatpush.msrb.mxu1 %v1142_v53 }
 0x203   : > { %912 = vmatpush.msra.mxu1 %v690_v55  ;;  %v637_v55 = vld [vmem:[%s1904_s3 + $0x50] sm:$0xff] }
 0x205   : > { %913 = vmatpush.msra.mxu1 %v688_v62  ;;  %v670_v62 = vld [vmem:[%s1904_s3 + $0x158] sm:$0xff] }
 0x230   : > { %v474_v56 = vpop.permute.xlu2 %473 }
 0x231   : > { %v1444_v60 = vmul.f32 %v474_v56, %v1286_v11  ;;  %v1447_v61 = vmul.f32 %v474_v56, %v1288_v12  ;;  %v1125_v11 = vld [vmem:[%s1904_s3 + $0x280] sm:$0xff] }
 0x232   : > { %v1157_v12 = vld [vmem:[%s1904_s3 + $0x380] sm:$0xff]  ;;  %771 = vmatpush.msrb.mxu2 %v1125_v11 }
 0x233   : > { %530 = vst [vmem:[%s1432_s6 + $0x10] sm:$0xff] %v1444_v60  ;;  %791 = vmatpush.msrb.mxu3 %v1157_v12  ;;  %v655_v56 = vld [vmem:[%s1904_s3 + $0xe0] sm:$0xff] }
 0x234   : > { %531 = vst [vmem:[%s1432_s6 + $0x18] sm:$0xff] %v1447_v61  ;;  %772 = vmatpush.msrb.mxu2 %v1123_v15  ;;  %v683_v15 = vld [vmem:[%s1904_s3 + $0x1c0] sm:$0xff] }
 0x235   : > { %792 = vmatpush.msrb.mxu3 %v1155_v16  ;;  %v652_v16 = vld [vmem:[%s1904_s3 + $0xc8] sm:$0xff] }
 0x236   : > { %773 = vmatpush.msrb.mxu2 %v1121_v23  ;;  %v681_v23 = vld [vmem:[%s1904_s3 + $0x1b0] sm:$0xff] }
 0x237   : > { %793 = vmatpush.msrb.mxu3 %v1153_v24 }
 0x238   : > { %v499_v26 = vpop.permute.xlu2 %498  ;;  %774 = vmatpush.msrb.mxu2 %v1119_v27  ;;  %v679_v27 = vld [vmem:[%s1904_s3 + $0x1a0] sm:$0xff] }
 0x239   : > { %v1505_v29 = vmul.f32 %v499_v26, %v1282_v9  ;;  %v1508_v30 = vmul.f32 %v499_v26, %v1284_v10  ;;  %794 = vmatpush.msrb.mxu3 %v1151_v28  ;;  %v1117_v9 = vld [vmem:[%s1904_s3 + $0x240] sm:$0xff]  ;;  %v648_v28 = vld [vmem:[%s1904_s3 + $0xa8] sm:$0xff] }
 0x23a   : > { %v1149_v10 = vld [vmem:[%s1904_s3 + $0x340] sm:$0xff]  ;;  %775 = vmatpush.msrb.mxu2 %v1117_v9  ;;  %v677_v9 = vld [vmem:[%s1904_s3 + $0x190] sm:$0xff] }
 0x23b   : > { %538 = vst [vmem:[%s1432_s6 + $0x50] sm:$0xff] %v1505_v29  ;;  %795 = vmatpush.msrb.mxu3 %v1149_v10  ;;  %v647_v26 = vld [vmem:[%s1904_s3 + $0xa0] sm:$0xff]  ;;  %v646_v10 = vld [vmem:[%s1904_s3 + $0x98] sm:$0xff] }
 0x23c   : > { %539 = vst [vmem:[%s1432_s6 + $0x58] sm:$0xff] %v1508_v30  ;;  %776 = vmatpush.msrb.mxu2 %v1115_v35  ;;  %v675_v35 = vld [vmem:[%s1904_s3 + $0x180] sm:$0xff] }
 0x23d   : > { %796 = vmatpush.msrb.mxu3 %v1147_v36  ;;  %v644_v36 = vld [vmem:[%s1904_s3 + $0x88] sm:$0xff] }
 0x23e   : > { %777 = vmatpush.msrb.mxu2 %v1113_v39  ;;  %v673_v39 = vld [vmem:[%s1904_s3 + $0x170] sm:$0xff] }
 0x23f   : > { %797 = vmatpush.msrb.mxu3 %v1145_v40 }
 0x240   : > { %778 = vmatpush.msrb.mxu2 %v1111_v43 }
 0x241   : > { %798 = vmatpush.msrb.mxu3 %v1143_v45 }
 0x242   : > { %779 = vmatpush.msrb.mxu2 %v1109_v49  ;;  %v674_v49 = vld [vmem:[%s1904_s3 + $0x178] sm:$0xff] }
 0x243   : > { %799 = vmatpush.msrb.mxu3 %v1141_v51  ;;  %v639_v51 = vld [vmem:[%s1904_s3 + $0x60] sm:$0xff] }
 0x244   : > { %852 = vmatpush.msra.mxu2 %v657_v54  ;;  %v671_v54 = vld [vmem:[%s1904_s3 + $0x160] sm:$0xff] }
 0x245   : > { %872 = vmatpush.msra.mxu3 %v689_v46 }
 0x246   : > { %853 = vmatpush.msra.mxu2 %v655_v56  ;;  %v669_v56 = vld [vmem:[%s1904_s3 + $0x150] sm:$0xff] }
 0x247   : > { %873 = vmatpush.msra.mxu3 %v687_v57  ;;  %v638_v57 = vld [vmem:[%s1904_s3 + $0x58] sm:$0xff] }
 0x248   : > { %v493_v59 = vpop.permute.xlu0 %492  ;;  %854 = vmatpush.msra.mxu2 %v653_v8  ;;  %v505_v24 = vpop.permute.xlu2 %504  ;;  %v667_v8 = vld [vmem:[%s1904_s3 + $0x140] sm:$0xff] }
 0x249   : > { %v468_v63 = vpop.permute.xlu1 %467  ;;  %v1605_v3 = vmul.f32 %v493_v59, %v1264_v0  ;;  %v1614_v7 = vmul.f32 %v493_v59, %v1266_v1  ;;  %v685_v0 = vld [vmem:[%s1904_s3 + $0x1d0] sm:$0xff]  ;;  %v686_v1 = vld [vmem:[%s1904_s3 + $0x1d8] sm:$0xff]  ;;  %v1722_v52 = vmul.f32 %v505_v24, %v1290_v13  ;;  %v640_v13 = vld [vmem:[%s1904_s3 + $0x68] sm:$0xff] }
 0x24a   : > { %v1608_v11 = vmul.f32 %v468_v63, %v1268_v2  ;;  %v1611_v12 = vmul.f32 %v468_v63, %v1272_v4  ;;  %v654_v2 = vld [vmem:[%s1904_s3 + $0xd8] sm:$0xff]  ;;  %v651_v4 = vld [vmem:[%s1904_s3 + $0xc0] sm:$0xff]  ;;  %874 = vmatpush.msra.mxu3 %v685_v0  ;;  %914 = vmatpush.msra.mxu1 %v686_v1  ;;  %v636_v0 = vld [vmem:[%s1904_s3 + $0x48] sm:$0xff] }
 0x24b   : > { %536 = vst [vmem:[%s1432_s6 + $0x40] sm:$0xff] %v1605_v3  ;;  %894 = vmatpush.msra.mxu0 %v654_v2  ;;  %855 = vmatpush.msra.mxu2 %v651_v4  ;;  %v609_v42 = vmax.f32 %v1605_v3, %v1505_v29  ;;  %v618_v43 = vmax.f32 %v1614_v7, %v1508_v30  ;;  %v635_v63 = vld [vmem:[%s1904_s3 + $0x40] sm:$0xff]  ;;  %v668_v4 = vld [vmem:[%s1904_s3 + $0x148] sm:$0xff] }
 0x24c   : > { %528 = vst [vmem:[%s1432_s6] sm:$0xff] %v1608_v11  ;;  %875 = vmatpush.msra.mxu3 %v683_v15  ;;  %915 = vmatpush.msra.mxu1 %v684_v17  ;;  %v633_v15 = vld [vmem:[%s1904_s3 + $0x30] sm:$0xff]  ;;  %v634_v17 = vld [vmem:[%s1904_s3 + $0x38] sm:$0xff] }
 0x24d   : > { %529 = vst [vmem:[%s1432_s6 + $0x8] sm:$0xff] %v1611_v12  ;;  %895 = vmatpush.msra.mxu0 %v652_v16  ;;  %856 = vmatpush.msra.mxu2 %v649_v22  ;;  %v665_v16 = vld [vmem:[%s1904_s3 + $0x130] sm:$0xff] }
 0x24e   : > { %537 = vst [vmem:[%s1432_s6 + $0x48] sm:$0xff] %v1614_v7  ;;  %876 = vmatpush.msra.mxu3 %v681_v23  ;;  %916 = vmatpush.msra.mxu1 %v682_v44  ;;  %v666_v44 = vld [vmem:[%s1904_s3 + $0x138] sm:$0xff] }
 0x24f   : > { %896 = vmatpush.msra.mxu0 %v650_v25  ;;  %857 = vmatpush.msra.mxu2 %v647_v26  ;;  %540 = vst [vmem:[%s1432_s6 + $0x60] sm:$0xff] %v1722_v52  ;;  %v631_v26 = vld [vmem:[%s1904_s3 + $0x20] sm:$0xff] }
 0x250   : > { %877 = vmatpush.msra.mxu3 %v679_v27  ;;  %917 = vmatpush.msra.mxu1 %v680_v31  ;;  %v663_v27 = vld [vmem:[%s1904_s3 + $0x120] sm:$0xff]  ;;  %v1222_v31 = vmov 32.0  }
 0x251   : > { %897 = vmatpush.msra.mxu0 %v648_v28  ;;  %858 = vmatpush.msra.mxu2 %v645_v32  ;;  %v632_v28 = vld [vmem:[%s1904_s3 + $0x28] sm:$0xff]  ;;  %1203 = vrcp.f32 %v1222_v31 }
 0x252   : > { %878 = vmatpush.msra.mxu3 %v677_v9  ;;  %918 = vmatpush.msra.mxu1 %v678_v33  ;;  %v664_v32 = vld [vmem:[%s1904_s3 + $0x128] sm:$0xff]  ;;  %v629_v9 = vld [vmem:[%s1904_s3 + $0x10] sm:$0xff]  ;;  %v553_v33 = vadd.f32 %v1447_v61, %v1611_v12 }
 0x253   : > { %898 = vmatpush.msra.mxu0 %v646_v10  ;;  %859 = vmatpush.msra.mxu2 %v643_v34  ;;  %v544_v10 = vadd.f32 %v1444_v60, %v1608_v11  ;;  %v591_v34 = vmax.f32 %v1608_v11, %v1444_v60  ;;  %v662_v60 = vld [vmem:[%s1904_s3 + $0x118] sm:$0xff]  ;;  %v627_v11 = vld [vmem:[%s1904_s3] sm:$0xff] }
 0x254   : > { %879 = vmatpush.msra.mxu3 %v675_v35  ;;  %919 = vmatpush.msra.mxu1 %v676_v37  ;;  %v661_v35 = vld [vmem:[%s1904_s3 + $0x110] sm:$0xff] }
 0x255   : > { %899 = vmatpush.msra.mxu0 %v644_v36  ;;  %860 = vmatpush.msra.mxu2 %v641_v38  ;;  %v630_v36 = vld [vmem:[%s1904_s3 + $0x18] sm:$0xff] }
 0x256   : > { %880 = vmatpush.msra.mxu3 %v673_v39  ;;  %920 = vmatpush.msra.mxu1 %v674_v49 }
 0x257   : > { %900 = vmatpush.msra.mxu0 %v642_v41  ;;  %861 = vmatpush.msra.mxu2 %v639_v51  ;;  %v600_v41 = vmax.f32 %v1611_v12, %v1447_v61  ;;  %v1842_v61 = vpop.eup %1203 }
 0x258   : > { %v511_v40 = vpop.permute.xlu2 %510  ;;  %881 = vmatpush.msra.mxu3 %v671_v54  ;;  %921 = vmatpush.msra.mxu1 %v672_v50  ;;  %vm585_vm12 = vweird.f32 %v1842_v61 }
 0x259   : > { %v480_v45 = vpop.permute.xlu1 %479  ;;  %v1731_v53 = vmul.f32 %v511_v40, %v1302_v19  ;;  %v610_v19 = vmax.f32 %v609_v42, %v1722_v52  ;;  %901 = vmatpush.msra.mxu0 %v640_v13  ;;  %862 = vmatpush.msra.mxu2 %v637_v55  ;;  %v659_v42 = vld [vmem:[%s1904_s3 + $0x100] sm:$0xff] }
 0x25a   : > { %v1710_v47 = vmul.f32 %v480_v45, %v1274_v5  ;;  %v1713_v48 = vmul.f32 %v480_v45, %v1276_v6  ;;  %v1725_v5 = vmul.f32 %v505_v24, %v1292_v14  ;;  %v1728_v6 = vmul.f32 %v511_v40, %v1300_v18  ;;  %882 = vmatpush.msra.mxu3 %v669_v56 }
 0x25b   : > { %v562_v14 = vadd.f32 %v1505_v29, %v1605_v3  ;;  %v571_v18 = vadd.f32 %v1508_v30, %v1614_v7  ;;  %902 = vmatpush.msra.mxu0 %v638_v57  ;;  %922 = vmatpush.msra.mxu1 %v670_v62  ;;  %543 = vst [vmem:[%s1432_s6 + $0x78] sm:$0xff] %v1731_v53 }
 0x25c   : > { %532 = vst [vmem:[%s1432_s6 + $0x20] sm:$0xff] %v1710_v47  ;;  %v619_v46 = vmax.f32 %v618_v43, %v1725_v5  ;;  %v611_v58 = vmax.f32 %v610_v19, %v1728_v6  ;;  %863 = vmatpush.msra.mxu2 %v635_v63  ;;  %883 = vmatpush.msra.mxu3 %v667_v8  ;;  %v628_v43 = vld [vmem:[%s1904_s3 + $0x8] sm:$0xff] }
 0x25d   : > { %533 = vst [vmem:[%s1432_s6 + $0x28] sm:$0xff] %v1713_v48  ;;  %v563_v2 = vadd.f32 %v562_v14, %v1722_v52  ;;  %v572_v1 = vadd.f32 %v571_v18, %v1725_v5  ;;  %903 = vmatpush.msra.mxu0 %v636_v0  ;;  %923 = vmatpush.msra.mxu1 %v668_v4 }
 0x25e   : > { %v620_v59 = vmax.f32 %v619_v46, %v1731_v53  ;;  %541 = vst [vmem:[%s1432_s6 + $0x68] sm:$0xff] %v1725_v5  ;;  %v612_v24 = vrot.slane %v611_v58, 4  ;;  %864 = vmatpush.msra.mxu2 %v633_v15  ;;  %884 = vmatpush.msra.mxu3 %v665_v16  ;;  %v545_v45 = vadd.f32 %v544_v10, %v1710_v47 }
 0x25f   : > { %v564_v22 = vadd.f32 %v563_v2, %v1728_v6  ;;  %v573_v23 = vadd.f32 %v572_v1, %v1731_v53  ;;  %904 = vmatpush.msra.mxu0 %v634_v17  ;;  %924 = vmatpush.msra.mxu1 %v666_v44  ;;  %v554_v49 = vadd.f32 %v553_v33, %v1713_v48 }
 0x260   : > { %v621_v25 = vrot.slane %v620_v59, 4  ;;  %865 = vmatpush.msra.mxu2 %v631_v26  ;;  %v613_v39 = vmax.f32 %v611_v58, %v612_v24  ;;  %885 = vmatpush.msra.mxu3 %v663_v27  ;;  %v592_v51 = vmax.f32 %v591_v34, %v1710_v47  ;;  %v601_v12 = vmax.f32 %v600_v41, %v1713_v48  ;;  %v660_v47 = vld [vmem:[%s1904_s3 + $0x108] sm:$0xff] }
 0x261   : > { %v565_v37 = vrot.slane %v564_v22, 4  ;;  %v574_v38 = vrot.slane %v573_v23, 4  ;;  %905 = vmatpush.msra.mxu0 %v632_v28  ;;  %925 = vmatpush.msra.mxu1 %v664_v32  ;;  %542 = vst [vmem:[%s1432_s6 + $0x70] sm:$0xff] %v1728_v6 }
 0x262   : > { %v622_v40 = vmax.f32 %v620_v59, %v621_v25  ;;  %866 = vmatpush.msra.mxu2 %v629_v9  ;;  %886 = vmatpush.msra.mxu3 %v661_v35  ;;  %v614_v46 = vrot.slane %v613_v39, 2 }
 0x263   : > { %906 = vmatpush.msra.mxu0 %v630_v36  ;;  %926 = vmatpush.msra.mxu1 %v662_v60  ;;  %v566_v18 = vadd.f32 %v565_v37, %v564_v22  ;;  %v575_v19 = vadd.f32 %v574_v38, %v573_v23 }
 0x264   : > { %867 = vmatpush.msra.mxu2 %v627_v11  ;;  %v623_v50 = vrot.slane %v622_v40, 2  ;;  %887 = vmatpush.msra.mxu3 %v659_v42  ;;  %v615_v0 = vmax.f32 %v613_v39, %v614_v46 }
 0x265   : > { %907 = vmatpush.msra.mxu0 %v628_v43  ;;  %927 = vmatpush.msra.mxu1 %v660_v47  ;;  %v567_v63 = vrot.slane %v566_v18, 2  ;;  %v576_v8 = vrot.slane %v575_v19, 2 }
 0x266   : > { %v624_v2 = vmax.f32 %v622_v40, %v623_v50  ;;  %v616_v27 = vrot.slane %v615_v0, 1 }
 0x267   : > { %v568_v44 = vadd.f32 %v567_v63, %v566_v18  ;;  %v577_v26 = vadd.f32 %v576_v8, %v575_v19 }
 0x268   : > { %v625_v28 = vrot.slane %v624_v2, 1  ;;  %v617_v60 = vmax.f32 %v615_v0, %v616_v27 }
 0x269   : > { %v486_v54 = vpop.permute.xlu1 %485  ;;  %v569_v38 = vrot.slane %v568_v44, 1  ;;  %v578_v39 = vrot.slane %v577_v26, 1 }
 0x26a   : > { %v518_v13 = vmul.f32 %v486_v54, %v1304_v20  ;;  %v519_v14 = vmul.f32 %v486_v54, %v1306_v21  ;;  %v581_v21 = vmul.f32 32.0, %v1842_v61  ;;  %v626_v41 = vmax.f32 %v624_v2, %v625_v28 }
 0x26b   : > { %v570_v54 = vadd.f32 %v569_v38, %v568_v44 }
 0x26c   : > { %534 = vst [vmem:[%s1432_s6 + $0x30] sm:$0xff] %v518_v13  ;;  %v546_v48 = vadd.f32 %v545_v45, %v518_v13  ;;  %v555_v20 = vadd.f32 %v554_v49, %v519_v14  ;;  %v593_v55 = vmax.f32 %v592_v51, %v518_v13  ;;  %v602_v56 = vmax.f32 %v601_v12, %v519_v14 }
 0x26d   : > { %535 = vst [vmem:[%s1432_s6 + $0x38] sm:$0xff] %v519_v14  ;;  %v582_v17 = vsub.f32 1.0, %v581_v21  ;;  %v579_v12 = vadd.f32 %v578_v39, %v577_v26 }
 0x26e   : > { %v547_v57 = vrot.slane %v546_v48, 4  ;;  %v556_v58 = vrot.slane %v555_v20, 4  ;;  %v594_v59 = vrot.slane %v593_v55, 4  ;;  %v603_v62 = vrot.slane %v602_v56, 4 }
 0x26f   : > { %v583_v33 = vmul.f32 %v1842_v61, %v582_v17 }
 0x270   : > { %v548_v1 = vadd.f32 %v547_v57, %v546_v48  ;;  %v557_v4 = vadd.f32 %v556_v58, %v555_v20  ;;  %v595_v15 = vmax.f32 %v593_v55, %v594_v59  ;;  %v604_v16 = vmax.f32 %v602_v56, %v603_v62 }
 0x271   : > { %v584_v42 = vadd.f32 %v1842_v61, %v583_v33 }
 0x272   : > { %v549_v22 = vrot.slane %v548_v1, 2  ;;  %v558_v23 = vrot.slane %v557_v4, 2  ;;  %v596_v24 = vrot.slane %v595_v15, 2  ;;  %v605_v25 = vrot.slane %v604_v16, 2 }
 0x273   : > { %v586_v13 = vsel %vm585_vm12, %v1842_v61, %v584_v42 }
 0x274   : > { %v550_v31 = vadd.f32 %v549_v22, %v548_v1  ;;  %v559_v32 = vadd.f32 %v558_v23, %v557_v4  ;;  %v597_v9 = vmax.f32 %v595_v15, %v596_v24  ;;  %v606_v10 = vmax.f32 %v604_v16, %v605_v25 }
 0x275   : > { %v589_v18 = vmul.f32 %v586_v13, %v570_v54  ;;  %v590_v19 = vmul.f32 %v586_v13, %v579_v12  ;;  %v971_v54 = vld [vmem:[%s1432_s6 + $0x8] sm:$0xff]  ;;  %v972_v12 = vld [vmem:[%s1432_s6 + $0x10] sm:$0xff] }
 0x276   : > { %v551_v34 = vrot.slane %v550_v31, 1  ;;  %v560_v35 = vrot.slane %v559_v32, 1  ;;  %v598_v36 = vrot.slane %v597_v9, 1  ;;  %v607_v37 = vrot.slane %v606_v10, 1 }
 0x278   : > { %v599_v40 = vmax.f32 %v597_v9, %v598_v36  ;;  %v608_v11 = vmax.f32 %v606_v10, %v607_v37  ;;  %v552_v49 = vadd.f32 %v551_v34, %v550_v31  ;;  %v561_v51 = vadd.f32 %v560_v35, %v559_v32 }
 0x27a   : > { %v760_v43 = vsel %vm319_vm4, %v617_v60, %v599_v40  ;;  %v761_v45 = vsel %vm319_vm4, %v626_v41, %v608_v11  ;;  %v587_v14 = vmul.f32 %v586_v13, %v552_v49  ;;  %v588_v47 = vmul.f32 %v586_v13, %v561_v51  ;;  %v970_v51 = vld [vmem:[%s1432_s6] sm:$0xff]  ;;  %v973_v13 = vld [vmem:[%s1432_s6 + $0x18] sm:$0xff] }
 0x27b   : > { %780 = vmatmul.f32.vlgmr.msrb.gmra.mxu2 %v760_v43  ;;  %800 = vmatmul.f32.vlgmr.msrb.gmra.mxu3 %v761_v45 }
 0x27c   : > { %820 = vmatmul.f32.vlgmr.msrb.gmra.mxu0 %v760_v43  ;;  %840 = vmatmul.f32.vlgmr.msrb.gmra.mxu1 %v761_v45  ;;  %v848_v46 = vsel %vm319_vm4, %v589_v18, %v587_v14  ;;  %v849_v50 = vsel %vm319_vm4, %v590_v19, %v588_v47  ;;  %v974_v18 = vld [vmem:[%s1432_s6 + $0x20] sm:$0xff] }
 0x283   : > { %868 = vmatmul.f32.vlgmr.msra.gmra.mxu2 %v848_v46  ;;  %888 = vmatmul.f32.vlgmr.msra.gmra.mxu3 %v849_v50 }
 0x284   : > { %908 = vmatmul.f32.vlgmr.msra.gmra.mxu0 %v848_v46  ;;  %928 = vmatmul.f32.vlgmr.msra.gmra.mxu1 %v849_v50  ;;  %v975_v50 = vld [vmem:[%s1432_s6 + $0x28] sm:$0xff] }
 0x2f9   : > { %v821_v48 = vpop.f32.mrf.mxu0  ;;  %v841_v20 = vpop.f32.mrf.mxu1 }
 0x2fa   : > { %v842_v21 = vadd.f32 %v841_v20, %v821_v48 }
 0x2fe   : > { %v781_v55 = vpop.f32.mrf.mxu2  ;;  %v801_v56 = vpop.f32.mrf.mxu3 }
 0x2ff   : > { %v802_v62 = vadd.f32 %v801_v56, %v781_v55  ;;  %v976_v55 = vld [vmem:[%s1432_s6 + $0x30] sm:$0xff] }
 0x301   : > { %v909_v57 = vpop.f32.mrf.mxu0  ;;  %v929_v61 = vpop.f32.mrf.mxu1 }
 0x302   : > { %v910_v58 = vadd.f32 %v909_v57, %v842_v21  ;;  %v977_v57 = vld [vmem:[%s1432_s6 + $0x38] sm:$0xff] }
 0x304   : > { %v930_v59 = vadd.f32 %v929_v61, %v910_v58 }
 0x306   : > { %v1174_v63 = vmul.f32 -1.442695, %v930_v59  ;;  %v869_v8 = vpop.f32.mrf.mxu2  ;;  %v889_v2 = vpop.f32.mrf.mxu3 }
 0x307   : > { %v870_v0 = vadd.f32 %v869_v8, %v802_v62 }
 0x308   : > { %1205 = vpow2.f32 %v1174_v63 }
 0x309   : > { %v890_v1 = vadd.f32 %v889_v2, %v870_v0 }
 0x30b   : > { %v1173_v4 = vmul.f32 -1.442695, %v890_v1 }
 0x30d   : > { %1207 = vpow2.f32 %v1173_v4 }
 0x30e   : > { %v1206_v15 = vpop.eup %1205 }
 0x30f   : > { %v939_v16 = vadd.f32 1.0, %v1206_v15 }
 0x311   : > { %1209 = vrcp.f32 %v939_v16  ;;  %v966_v27 = vand.u32 2147483648, %v939_v16  ;;  %v964_v28 = vand.u32 2147483647, %v939_v16  ;;  %vm960_vm14 = vweird.f32 %v939_v16 }
 0x313   : > { %v1208_v17 = vpop.eup %1207  ;;  %v967_v33 = vor.u32 1.1754944e-38, %v966_v27  ;;  %vm965_vm0 = vcmp.eq.f32.partialorder %v964_v28, 8.507059e+37 }
 0x314   : > { %v938_v22 = vadd.f32 1.0, %v1208_v17 }
 0x316   : > { %1211 = vrcp.f32 %v938_v22  ;;  %v951_v34 = vand.u32 2147483648, %v938_v22  ;;  %v949_v36 = vand.u32 2147483647, %v938_v22  ;;  %vm945_vm2 = vweird.f32 %v938_v22 }
 0x317   : > { %v1210_v23 = vpop.eup %1209 }
 0x318   : > { %v956_v24 = vmul.f32 %v1210_v23, %v939_v16  ;;  %vm961_vm13 = vweird.f32 %v1210_v23  ;;  %v952_v39 = vor.u32 1.1754944e-38, %v951_v34  ;;  %vm950_vm6 = vcmp.eq.f32.partialorder %v949_v36, 8.507059e+37 }
 0x319   : > { %vm962_vm15 = vmor %vm960_vm14, %vm961_vm13 }
 0x31a   : > { %v957_v25 = vsub.f32 1.0, %v956_v24 }
 0x31c   : > { %v1212_v44 = vpop.eup %1211  ;;  %v958_v26 = vmul.f32 %v1210_v23, %v957_v25 }
 0x31d   : > { %v941_v31 = vmul.f32 %v1212_v44, %v938_v22  ;;  %vm946_vm1 = vweird.f32 %v1212_v44 }
 0x31e   : > { %v959_v32 = vadd.f32 %v1210_v23, %v958_v26  ;;  %vm947_vm3 = vmor %vm945_vm2, %vm946_vm1 }
 0x31f   : > { %v942_v9 = vsub.f32 1.0, %v941_v31 }
 0x320   : > { %v963_v10 = vsel %vm962_vm15, %v1210_v23, %v959_v32 }
 0x321   : > { %v943_v35 = vmul.f32 %v1212_v44, %v942_v9  ;;  %v968_v37 = vsel %vm965_vm0, %v967_v33, %v963_v10 }
 0x322   : > { %v988_v40 = vrot.slane %v968_v37, 7 }
 0x323   : > { %v944_v38 = vadd.f32 %v1212_v44, %v943_v35 }
 0x325   : > { %v948_v60 = vsel %vm947_vm3, %v1212_v44, %v944_v38 }
 0x326   : > { %v953_v11 = vsel %vm950_vm6, %v952_v39, %v948_v60 }
 0x327   : > { %v990_v41 = vsel %vm989_vm5, %v953_v11, %v988_v40  ;;  %v991_v42 = vsel %vm319_vm4, %v953_v11, %v988_v40 }
 0x328   : > { %v992_v43 = vrot.slane %v991_v42, 1  ;;  %v993_v45 = vperm.slane %v990_v41, 0  ;;  %v994_v49 = vperm.slane %v990_v41, 1 }
 0x32a   : > { %v1001_v14 = vmul.f32 %v993_v45, %v970_v51  ;;  %v1002_v47 = vmul.f32 %v994_v49, %v971_v54  ;;  %v1003_v19 = vmul.f32 %v993_v45, %v972_v12  ;;  %v1004_v46 = vmul.f32 %v994_v49, %v973_v13 }
 0x32b   : > { %v995_v48 = vperm.slane %v992_v43, 0  ;;  %v1005_v20 = vmul.f32 %v993_v45, %v974_v18  ;;  %v996_v56 = vperm.slane %v992_v43, 1  ;;  %v1006_v21 = vmul.f32 %v994_v49, %v975_v50 }
 0x32c   : > { %1017 = vst [vmem:[%s1432_s6] sm:$0xff] %v1001_v14  ;;  %v1007_v58 = vmul.f32 %v993_v45, %v976_v55  ;;  %v1008_v61 = vmul.f32 %v994_v49, %v977_v57 }
 0x32d   : > { %1018 = vst [vmem:[%s1432_s6 + $0x8] sm:$0xff] %v1002_v47  ;;  %v1009_v59 = vmul.f32 %v995_v48, %v1605_v3  ;;  %v1010_v62 = vmul.f32 %v996_v56, %v1614_v7  ;;  %v1011_v63 = vmul.f32 %v995_v48, %v1505_v29  ;;  %v1012_v8 = vmul.f32 %v996_v56, %v1508_v30 }
 0x32e   : > { %1019 = vst [vmem:[%s1432_s6 + $0x10] sm:$0xff] %v1003_v19  ;;  %v1013_v0 = vmul.f32 %v995_v48, %v1722_v52  ;;  %v1014_v2 = vmul.f32 %v996_v56, %v1725_v5  ;;  %v1015_v3 = vmul.f32 %v995_v48, %v1728_v6  ;;  %v1016_v7 = vmul.f32 %v996_v56, %v1731_v53 }
 0x32f   : > { %1020 = vst [vmem:[%s1432_s6 + $0x18] sm:$0xff] %v1004_v46 }
 0x330   : > { %1021 = vst [vmem:[%s1432_s6 + $0x20] sm:$0xff] %v1005_v20 }
 0x331   : > { %1022 = vst [vmem:[%s1432_s6 + $0x28] sm:$0xff] %v1006_v21 }
 0x332   : > { %1023 = vst [vmem:[%s1432_s6 + $0x30] sm:$0xff] %v1007_v58 }
 0x333   : > { %1024 = vst [vmem:[%s1432_s6 + $0x38] sm:$0xff] %v1008_v61 }
 0x334   : > { %1025 = vst [vmem:[%s1432_s6 + $0x40] sm:$0xff] %v1009_v59 }
 0x335   : > { %1026 = vst [vmem:[%s1432_s6 + $0x48] sm:$0xff] %v1010_v62 }
 0x336   : > { %1027 = vst [vmem:[%s1432_s6 + $0x50] sm:$0xff] %v1011_v63 }
 0x337   : > { %1028 = vst [vmem:[%s1432_s6 + $0x58] sm:$0xff] %v1012_v8 }
 0x338   : > { %1029 = vst [vmem:[%s1432_s6 + $0x60] sm:$0xff] %v1013_v0 }
 0x339   : > { %1030 = vst [vmem:[%s1432_s6 + $0x68] sm:$0xff] %v1014_v2 }
 0x33a   : > { %1031 = vst [vmem:[%s1432_s6 + $0x70] sm:$0xff] %v1015_v3 }
 0x33b   : > { %1032 = vst [vmem:[%s1432_s6 + $0x78] sm:$0xff] %v1016_v7 }
 0x33c PF: > { %s14_s15 = sadd.s32 1, %s1219_s15  }
 0x33d   : > { %p11_p4 = scmp.ge.s32.totalorder %s14_s15, 4  }
 0x33f   :  { %13 = sbr.rel (!%p11_p4) target bundleno = 1 (0x1), region = 67 }

</bundles_post_ra>
